<compile_context>
chip_gen: v7x
topology: tpu7x:2x2x1
jax: 0.10.0
libtpu: 0.0.40
codegen_flags: <defaults>
</compile_context>

<pallas_src>
import jax
import jax.numpy as jnp
from jax.experimental import pallas as pl
from jax.experimental.pallas import tpu as pltpu

SMEM_SPEC = pl.BlockSpec(memory_space=pltpu.MemorySpace.SMEM)


def _round_up(v, m):
    return ((v + m - 1) // m) * m


# ---------------------------------------------------------------------------
# Fused DUM kernel (grid = (node-row tiles i [parallel], contraction tiles k [arbitrary]))
#   logits_acc += A[i, k] @ (X[k] @ w_score)                 (bf16 MXU, f32 acc)
#   at k == last:
#     score     = sigmoid(logits_acc + b_score)              -> score_ref (used by XLA gate)
#     kk        = (diff(S) > 1 - threshold).sum() + 1
#     x_svd     = (U[i] * S_masked) @ Vh
#     x_fused   = 0.5 * x[i] + 0.5 * x_svd
#     x_enh     = (relu(x_fused @ W1 + b1) @ W2 + b2) * score + x_fused
# ---------------------------------------------------------------------------
def dum_fused_kernel(scal_f_ref, scal_i_ref, a_ref, xk_ref, wsc_ref, xi_ref,
                     u_ref, s_ref, vh_ref, w1_ref, b1_ref, w2_ref, b2_ref,
                     score_ref, xenh_ref, acc_ref):
    k_id = pl.program_id(1)
    k_last = pl.num_programs(1) - 1

    @pl.when(k_id == 0)
    def _():
        acc_ref[...] = jnp.zeros_like(acc_ref)

    # ---- GCN + folded score head: partial logits for this contraction tile ----
    t = jnp.dot(xk_ref[...], wsc_ref[...],
                preferred_element_type=jnp.float32)                      # (tk, 1) f32
    acc_ref[...] += jnp.dot(a_ref[...], t.astype(jnp.bfloat16),
                            preferred_element_type=jnp.float32)          # (tm, 1) f32

    @pl.when(k_id == k_last)
    def _():
        b_score = scal_f_ref[0]
        diff_thr = scal_f_ref[1]       # = 1 - threshold
        m_valid = scal_i_ref[0]        # number of real singular values

        score = jax.nn.sigmoid(acc_ref[...] + b_score)                   # (tm, 1) f32
        score_ref[...] = score

        # ---- SVD rank selection: adjacent diff via XLU roll (no lane slices) ----
        s = s_ref[...]                                                   # (1, Mp) f32
        s_next = pltpu.roll(s, shift=s.shape[-1] - 1, axis=1)            # s_next[i] = s[i+1]
        lane = jax.lax.broadcasted_iota(jnp.int32, s.shape, 1)
        valid = lane < (m_valid - 1)
        kk = jnp.sum(jnp.where(valid & ((s_next - s) > diff_thr), 1, 0)) + 1
        s_masked = jnp.where(lane < kk, s, 0.0)                          # (1, Mp) f32

        # ---- low-rank reconstruction + fusion (bf16 MXU, f32 everywhere else) ----
        us = (u_ref[...].astype(jnp.float32) * s_masked).astype(jnp.bfloat16)
        x_svd = jnp.dot(us, vh_ref[...],
                        preferred_element_type=jnp.float32)              # (tm, D) f32
        x_fused = 0.5 * xi_ref[...] + 0.5 * x_svd

        # ---- FeatureEnhancer ----
        h1 = jnp.dot(x_fused.astype(jnp.bfloat16), w1_ref[...],
                     preferred_element_type=jnp.float32) + b1_ref[...]
        h1 = jnp.maximum(h1, 0.0)
        e = jnp.dot(h1.astype(jnp.bfloat16), w2_ref[...],
                    preferred_element_type=jnp.float32) + b2_ref[...]
        xenh_ref[...] = e * score + x_fused


# ---------------------------------------------------------------------------
# Glue: dense symmetric GCN normalization  A_hat = D^-1/2 (A + I) D^-1/2
# TODO(synk): for very large graphs replace the dense O(N^2) adjacency with a
# scalar-prefetch sparse (edge-blocked) aggregation; here it is dense but
# streamed into the kernel as bf16 tiles.
# ---------------------------------------------------------------------------
def gcn_norm_dense(edge_index, num_nodes):
    src, dst = edge_index[0], edge_index[1]
    a = jnp.zeros((num_nodes, num_nodes), jnp.float32).at[dst, src].add(1.0)
    a = a + jnp.eye(num_nodes, dtype=jnp.float32)
    deg = a.sum(axis=1)
    dinv = jnp.where(deg > 0, 1.0 / jnp.sqrt(deg), 0.0)
    return dinv[:, None] * a * dinv[None, :]


# ---------------------------------------------------------------------------
# DUM forward (single tiled pallas_call + tiny XLA epilogue for the edge gate)
# ---------------------------------------------------------------------------
def dum_forward(params, x, edge_index, edge_weights, threshold=0.9):
    n, d = x.shape
    out_dim = params["w1"].shape[1]
    assert out_dim == d, "residual `enh * score + x_fused` requires out_dim == in_dim"

    a_norm = gcn_norm_dense(edge_index, n)

    # TODO(synk): the SVD factorization itself has no Pallas equivalent; it is
    # computed with jnp.linalg.svd, everything downstream (rank selection,
    # reconstruction, fusion, enhancer) runs inside the fused kernel.
    u, s, vh = jnp.linalg.svd(x, full_matrices=False)
    m = s.shape[0]
    m_pad = _round_up(m, 128)       # lane/contraction-dim padding for the MXU

    # Node-row tiling: 256-multiples (fills the 2x256 MXU on v6e/v7x, 2x the
    # 128-wide v5e MXU) for large graphs, single full tile for small ones.
    if n > 256:
        n_pad = _round_up(n, 256)
        tm = tk = 256
    else:
        n_pad = _round_up(n, 8)
        tm = tk = n_pad
    gi, gk = n_pad // tm, n_pad // tk

    xf = jnp.pad(x.astype(jnp.float32), ((0, n_pad - n), (0, 0)))        # f32 rows (fusion)
    x_bf = xf.astype(jnp.bfloat16)                                        # bf16 rows (MXU)
    a_bf = jnp.pad(a_norm, ((0, n_pad - n), (0, n_pad - n))).astype(jnp.bfloat16)
    u_bf = jnp.pad(u, ((0, n_pad - n), (0, m_pad - m))).astype(jnp.bfloat16)
    s_row = jnp.pad(s, (0, m_pad - m)).reshape(1, m_pad).astype(jnp.float32)
    vh_bf = jnp.pad(vh, ((0, m_pad - m), (0, 0))).astype(jnp.bfloat16)

    # Folded score head: logits = A @ (X @ w_score) + b_score
    w_score = (params["wg"] @ params["wm"]).astype(jnp.bfloat16)          # (D, 1)
    b_score = (params["bg"] @ params["wm"] + params["bm"]).reshape(())

    scal_f = jnp.stack([b_score.astype(jnp.float32),
                        jnp.float32(1.0) - jnp.float32(threshold)]).astype(jnp.float32)
    scal_i = jnp.array([m], jnp.int32)

    score_out, x_enh = pl.pallas_call(
        dum_fused_kernel,
        out_shape=(jax.ShapeDtypeStruct((n_pad, 1), jnp.float32),
                   jax.ShapeDtypeStruct((n_pad, out_dim), jnp.float32)),
        grid=(gi, gk),
        in_specs=[
            SMEM_SPEC,                                                    # scal_f
            SMEM_SPEC,                                                    # scal_i
            pl.BlockSpec((tm, tk), lambda i, k: (i, k)),                  # a_norm (bf16)
            pl.BlockSpec((tk, d), lambda i, k: (k, 0)),                   # x rows for contraction (bf16)
            pl.BlockSpec((d, 1), lambda i, k: (0, 0)),                    # w_score (bf16)
            pl.BlockSpec((tm, d), lambda i, k: (i, 0)),                   # x rows for fusion (f32)
            pl.BlockSpec((tm, m_pad), lambda i, k: (i, 0)),               # U (bf16)
            pl.BlockSpec((1, m_pad), lambda i, k: (0, 0)),                # S (f32)
            pl.BlockSpec((m_pad, d), lambda i, k: (0, 0)),                # Vh (bf16)
            pl.BlockSpec((d, out_dim), lambda i, k: (0, 0)),              # W1 (bf16)
            pl.BlockSpec((1, out_dim), lambda i, k: (0, 0)),              # b1 (f32)
            pl.BlockSpec((out_dim, out_dim), lambda i, k: (0, 0)),        # W2 (bf16)
            pl.BlockSpec((1, out_dim), lambda i, k: (0, 0)),              # b2 (f32)
        ],
        out_specs=(pl.BlockSpec((tm, 1), lambda i, k: (i, 0)),
                   pl.BlockSpec((tm, out_dim), lambda i, k: (i, 0))),
        scratch_shapes=[pltpu.VMEM((tm, 1), jnp.float32)],
        compiler_params=pltpu.CompilerParams(
            dimension_semantics=("parallel", "arbitrary"),
            # raises the v5e/v6e scoped default; <= 48 MiB keeps headroom on v7x (64 MiB)
            vmem_limit_bytes=48 * 1024 * 1024),
    )(scal_f, scal_i, a_bf, x_bf, w_score, xf, u_bf, s_row, vh_bf,
      params["w1"].astype(jnp.bfloat16), params["b1"].astype(jnp.float32),
      params["w2"].astype(jnp.bfloat16), params["b2"].astype(jnp.float32))

    # GatingDenoising epilogue: O(E) gather + sigmoid gate in XLA (replaces the
    # O(N*E) one-hot matrix the kernel used to DMA/contract).
    # TODO(synk): could be fused back via a scalar-prefetch gather kernel if the
    # edge count ever makes this epilogue measurable.
    scores = score_out[:n, 0]
    src, dst = edge_index[0], edge_index[1]
    gate = jax.nn.sigmoid(params["alpha"] * (scores[src] + scores[dst]) + params["beta"])
    ew_out = edge_weights * gate

    return x_enh[:n], ew_out


# ---------------------------------------------------------------------------
# Pure-JAX f32 reference (same math) for a sanity check
# ---------------------------------------------------------------------------
def dum_reference(params, x, edge_index, edge_weights, threshold=0.9):
    n = x.shape[0]
    a_norm = gcn_norm_dense(edge_index, n)
    h = a_norm @ (x @ params["wg"]) + params["bg"]
    scores = jax.nn.sigmoid(h @ params["wm"] + params["bm"])[:, 0]

    gate = jax.nn.sigmoid(params["alpha"] * (scores[edge_index[0]] + scores[edge_index[1]])
                          + params["beta"])
    ew = edge_weights * gate

    u, s, vh = jnp.linalg.svd(x, full_matrices=False)
    diffs = s[1:] - s[:-1]
    k = jnp.sum((diffs > (1.0 - threshold)).astype(jnp.int32)) + 1
    s_masked = jnp.where(jnp.arange(s.shape[0]) < k, s, 0.0)
    x_svd = (u * s_masked[None, :]) @ vh
    x_fused = 0.5 * x + 0.5 * x_svd
    enh = jnp.maximum(x_fused @ params["w1"] + params["b1"], 0.0) @ params["w2"] + params["b2"]
    x_enh = enh * scores[:, None] + x_fused
    return x_enh, ew


if __name__ == "__main__":
    key = jax.random.PRNGKey(0)
    ks = jax.random.split(key, 10)

    N, E = 8, 16
    in_dim, hidden_dim, out_dim = 16, 32, 16   # out_dim == in_dim (required by residual add)

    x = jax.random.normal(ks[0], (N, in_dim), jnp.float32)
    edge_index = jax.random.randint(ks[1], (2, E), 0, N)
    edge_weights = jax.random.uniform(ks[2], (E,), jnp.float32)

    params = {
        # GCNConv(in_dim, hidden_dim)
        "wg": 0.1 * jax.random.normal(ks[3], (in_dim, hidden_dim), jnp.float32),
        "bg": jnp.zeros((1, hidden_dim), jnp.float32),
        # score MLP: Linear(hidden_dim, 1)
        "wm": 0.1 * jax.random.normal(ks[4], (hidden_dim, 1), jnp.float32),
        "bm": jnp.zeros((1, 1), jnp.float32),
        # GatingDenoising parameters
        "alpha": jnp.float32(1.0),
        "beta": jnp.float32(0.0),
        # FeatureEnhancer: Linear(in_dim, out_dim), Linear(out_dim, out_dim)
        "w1": 0.1 * jax.random.normal(ks[5], (in_dim, out_dim), jnp.float32),
        "b1": jnp.zeros((1, out_dim), jnp.float32),
        "w2": 0.1 * jax.random.normal(ks[6], (out_dim, out_dim), jnp.float32),
        "b2": jnp.zeros((1, out_dim), jnp.float32),
    }

    x_enh, ew_gated = dum_forward(params, x, edge_index, edge_weights, threshold=0.9)
    jax.block_until_ready((x_enh, ew_gated))

    x_ref, ew_ref = dum_reference(params, x, edge_index, edge_weights, threshold=0.9)
    # tolerance reflects bf16 MXU operands (f32 accumulation) vs. the pure-f32 reference
    assert jnp.allclose(x_enh, x_ref, atol=3e-2, rtol=3e-2)
    assert jnp.allclose(ew_gated, ew_ref, atol=5e-3, rtol=5e-3)

    print("KERNEL_OK")
</pallas_src>

<mosaic_0001>
module attributes {stable_mosaic.version = 11 : i64} {
  func.func @dum_fused_kernel(%arg0: i32, %arg1: i32, %arg2: memref<2xf32, #tpu.memory_space<smem>>, %arg3: memref<1xi32, #tpu.memory_space<smem>>, %arg4: memref<8x8xbf16, #tpu.memory_space<vmem>>, %arg5: memref<8x16xbf16, #tpu.memory_space<vmem>>, %arg6: memref<16x1xbf16, #tpu.memory_space<vmem>>, %arg7: memref<8x16xf32, #tpu.memory_space<vmem>>, %arg8: memref<8x128xbf16, #tpu.memory_space<vmem>>, %arg9: memref<1x128xf32, #tpu.memory_space<vmem>>, %arg10: memref<128x16xbf16, #tpu.memory_space<vmem>>, %arg11: memref<16x16xbf16, #tpu.memory_space<vmem>>, %arg12: memref<1x16xf32, #tpu.memory_space<vmem>>, %arg13: memref<16x16xbf16, #tpu.memory_space<vmem>>, %arg14: memref<1x16xf32, #tpu.memory_space<vmem>>, %arg15: memref<8x1xf32, #tpu.memory_space<vmem>>, %arg16: memref<8x16xf32, #tpu.memory_space<vmem>>, %arg17: memref<8x1xf32, #tpu.memory_space<vmem>>) attributes {dimension_semantics = [#tpu.dimension_semantics<parallel>, #tpu.dimension_semantics<arbitrary>], iteration_bounds = array<i64: 1, 1>, scalar_prefetch = 0 : i64, scratch_operands = 1 : i64, tpu.core_type = #tpu.core_type<tc>, window_params = [{transform_indices = @transform_0, window_bounds = array<i64: 2>}, {transform_indices = @transform_1, window_bounds = array<i64: 1>}, {transform_indices = @transform_2, window_bounds = array<i64: 8, 8>}, {transform_indices = @transform_3, window_bounds = array<i64: 8, 16>}, {pipeline_mode = #tpu.pipeline_mode<synchronous>, transform_indices = @transform_4, window_bounds = array<i64: 16, 1>}, {transform_indices = @transform_5, window_bounds = array<i64: 8, 16>}, {transform_indices = @transform_6, window_bounds = array<i64: 8, 128>}, {pipeline_mode = #tpu.pipeline_mode<synchronous>, transform_indices = @transform_7, window_bounds = array<i64: 1, 128>}, {pipeline_mode = #tpu.pipeline_mode<synchronous>, transform_indices = @transform_8, window_bounds = array<i64: 128, 16>}, {pipeline_mode = #tpu.pipeline_mode<synchronous>, transform_indices = @transform_9, window_bounds = array<i64: 16, 16>}, {pipeline_mode = #tpu.pipeline_mode<synchronous>, transform_indices = @transform_10, window_bounds = array<i64: 1, 16>}, {pipeline_mode = #tpu.pipeline_mode<synchronous>, transform_indices = @transform_11, window_bounds = array<i64: 16, 16>}, {pipeline_mode = #tpu.pipeline_mode<synchronous>, transform_indices = @transform_12, window_bounds = array<i64: 1, 16>}, {transform_indices = @transform_13, window_bounds = array<i64: 8, 1>}, {transform_indices = @transform_14, window_bounds = array<i64: 8, 16>}]} {
    %c0_i32 = arith.constant 0 : i32
    %0 = arith.cmpi eq, %arg1, %c0_i32 : i32
    %1 = arith.extui %0 : i1 to i32
    %c0_i32_0 = arith.constant 0 : i32
    %2 = arith.cmpi ne, %1, %c0_i32_0 : i32
    scf.if %2 {
      %cst_13 = arith.constant 0.000000e+00 : f32
      %15 = vector.broadcast %cst_13 : f32 to vector<8x1xf32>
      %c0_14 = arith.constant 0 : index
      %c0_15 = arith.constant 0 : index
      %16 = vector.load %arg17[%c0_14, %c0_15] : memref<8x1xf32, #tpu.memory_space<vmem>>, vector<8x1xf32>
      tpu.vector_store %arg17[%c0_14, %c0_15], %15 {strides = array<i32>} : memref<8x1xf32, #tpu.memory_space<vmem>>, vector<8x1xf32>,
    } else {
    }
    %c0 = arith.constant 0 : index
    %c0_1 = arith.constant 0 : index
    %3 = vector.load %arg5[%c0, %c0_1] : memref<8x16xbf16, #tpu.memory_space<vmem>>, vector<8x16xbf16>
    %c0_2 = arith.constant 0 : index
    %c0_3 = arith.constant 0 : index
    %4 = vector.load %arg6[%c0_2, %c0_3] : memref<16x1xbf16, #tpu.memory_space<vmem>>, vector<16x1xbf16>
    %cst = arith.constant dense<0.000000e+00> : vector<8x1xf32>
    %5 = tpu.matmul %3, %4, %cst {dimension_numbers = #tpu.dot_dimension_numbers<[1], [0], [0], [1], [0, 0, 1, 1], [], []>} : vector<8x16xbf16>, vector<16x1xbf16>, vector<8x1xf32> -> vector<8x1xf32>
    %c0_4 = arith.constant 0 : index
    %c0_5 = arith.constant 0 : index
    %6 = vector.load %arg17[%c0_4, %c0_5] : memref<8x1xf32, #tpu.memory_space<vmem>>, vector<8x1xf32>
    %c0_6 = arith.constant 0 : index
    %c0_7 = arith.constant 0 : index
    %7 = vector.load %arg4[%c0_6, %c0_7] : memref<8x8xbf16, #tpu.memory_space<vmem>>, vector<8x8xbf16>
    %8 = arith.truncf %5 : vector<8x1xf32> to vector<8x1xbf16>
    %cst_8 = arith.constant dense<0.000000e+00> : vector<8x1xf32>
    %9 = tpu.matmul %7, %8, %cst_8 {dimension_numbers = #tpu.dot_dimension_numbers<[1], [0], [0], [1], [0, 0, 1, 1], [], []>} : vector<8x8xbf16>, vector<8x1xbf16>, vector<8x1xf32> -> vector<8x1xf32>
    %10 = arith.addf %6, %9 : vector<8x1xf32>
    %c0_9 = arith.constant 0 : index
    %c0_10 = arith.constant 0 : index
    %11 = vector.load %arg17[%c0_9, %c0_10] : memref<8x1xf32, #tpu.memory_space<vmem>>, vector<8x1xf32>
    tpu.vector_store %arg17[%c0_9, %c0_10], %10 {strides = array<i32>} : memref<8x1xf32, #tpu.memory_space<vmem>>, vector<8x1xf32>,
    %c0_i32_11 = arith.constant 0 : i32
    %12 = arith.cmpi eq, %arg1, %c0_i32_11 : i32
    %13 = arith.extui %12 : i1 to i32
    %c0_i32_12 = arith.constant 0 : i32
    %14 = arith.cmpi ne, %13, %c0_i32_12 : i32
    scf.if %14 {
      %c0_13 = arith.constant 0 : index
      %15 = memref.load %arg2[%c0_13] : memref<2xf32, #tpu.memory_space<smem>>
      %c1 = arith.constant 1 : index
      %16 = memref.load %arg2[%c1] : memref<2xf32, #tpu.memory_space<smem>>
      %c0_14 = arith.constant 0 : index
      %17 = memref.load %arg3[%c0_14] : memref<1xi32, #tpu.memory_space<smem>>
      %c0_15 = arith.constant 0 : index
      %c0_16 = arith.constant 0 : index
      %18 = vector.load %arg17[%c0_15, %c0_16] : memref<8x1xf32, #tpu.memory_space<vmem>>, vector<8x1xf32>
      %19 = vector.broadcast %15 : f32 to vector<8x1xf32>
      %20 = arith.addf %18, %19 : vector<8x1xf32>
      %21 = arith.negf %20 : vector<8x1xf32>
      %22 = math.exp %21 : vector<8x1xf32>
      %cst_17 = arith.constant 1.000000e+00 : f32
      %23 = vector.broadcast %cst_17 : f32 to vector<8x1xf32>
      %24 = arith.addf %23, %22 : vector<8x1xf32>
      %25 = arith.divf %23, %24 : vector<8x1xf32>
      %c0_18 = arith.constant 0 : index
      %c0_19 = arith.constant 0 : index
      %26 = vector.load %arg15[%c0_18, %c0_19] : memref<8x1xf32, #tpu.memory_space<vmem>>, vector<8x1xf32>
      tpu.vector_store %arg15[%c0_18, %c0_19], %25 {strides = array<i32>} : memref<8x1xf32, #tpu.memory_space<vmem>>, vector<8x1xf32>,
      %c0_20 = arith.constant 0 : index
      %c0_21 = arith.constant 0 : index
      %27 = vector.load %arg9[%c0_20, %c0_21] : memref<1x128xf32, #tpu.memory_space<vmem>>, vector<1x128xf32>
      %c127_i32 = arith.constant 127 : i32
      %28 = tpu.dynamic_rotate %27 by %c127_i32 dim 1 : vector<1x128xf32>, i32 -> vector<1x128xf32>
      %29 = tpu.iota {dimensions = array<i32: 1>} : vector<1x128xi32>
      %c1_i32 = arith.constant 1 : i32
      %30 = arith.subi %17, %c1_i32 : i32
      %31 = vector.broadcast %30 : i32 to vector<1x128xi32>
      %32 = arith.cmpi slt, %29, %31 : vector<1x128xi32>
      %33 = arith.subf %28, %27 : vector<1x128xf32>
      %34 = vector.broadcast %16 : f32 to vector<1x128xf32>
      %35 = arith.cmpf ogt, %33, %34 : vector<1x128xf32>
      %36 = arith.andi %32, %35 : vector<1x128xi1>
      %c1_i32_22 = arith.constant 1 : i32
      %c0_i32_23 = arith.constant 0 : i32
      %37 = vector.broadcast %c1_i32_22 : i32 to vector<1x128xi32>
      %38 = vector.broadcast %c0_i32_23 : i32 to vector<1x128xi32>
      %39 = arith.select %36, %37, %38 : vector<1x128xi1>, vector<1x128xi32>
      %40 = vector.shape_cast %39 : vector<1x128xi32> to vector<1x1x128xi32>
      %cst_24 = arith.constant dense<0> : vector<1xi32>
      %41 = vector.multi_reduction <add>, %40, %cst_24 [1, 2] : vector<1x1x128xi32> to vector<1xi32>
      %42 = vector.shape_cast %41 : vector<1xi32> to vector<1x1x1xi32>
      %43 = vector.extract %42[0, 0, 0] : i32 from vector<1x1x1xi32>
      %c1_i32_25 = arith.constant 1 : i32
      %44 = arith.addi %43, %c1_i32_25 : i32
      %45 = vector.broadcast %44 : i32 to vector<1x128xi32>
      %46 = arith.cmpi slt, %29, %45 : vector<1x128xi32>
      %cst_26 = arith.constant 0.000000e+00 : f32
      %47 = vector.broadcast %cst_26 : f32 to vector<1x128xf32>
      %48 = arith.select %46, %27, %47 : vector<1x128xi1>, vector<1x128xf32>
      %c0_27 = arith.constant 0 : index
      %c0_28 = arith.constant 0 : index
      %49 = vector.load %arg8[%c0_27, %c0_28] : memref<8x128xbf16, #tpu.memory_space<vmem>>, vector<8x128xbf16>
      %50 = arith.extf %49 : vector<8x128xbf16> to vector<8x128xf32>
      %51 = vector.broadcast %48 : vector<1x128xf32> to vector<8x128xf32>
      %52 = arith.mulf %50, %51 : vector<8x128xf32>
      %53 = arith.truncf %52 : vector<8x128xf32> to vector<8x128xbf16>
      %c0_29 = arith.constant 0 : index
      %c0_30 = arith.constant 0 : index
      %54 = vector.load %arg10[%c0_29, %c0_30] : memref<128x16xbf16, #tpu.memory_space<vmem>>, vector<128x16xbf16>
      %cst_31 = arith.constant dense<0.000000e+00> : vector<8x16xf32>
      %55 = tpu.matmul %53, %54, %cst_31 {dimension_numbers = #tpu.dot_dimension_numbers<[1], [0], [0], [1], [0, 0, 1, 1], [], []>} : vector<8x128xbf16>, vector<128x16xbf16>, vector<8x16xf32> -> vector<8x16xf32>
      %c0_32 = arith.constant 0 : index
      %c0_33 = arith.constant 0 : index
      %56 = vector.load %arg7[%c0_32, %c0_33] : memref<8x16xf32, #tpu.memory_space<vmem>>, vector<8x16xf32>
      %cst_34 = arith.constant 5.000000e-01 : f32
      %57 = vector.broadcast %cst_34 : f32 to vector<8x16xf32>
      %58 = arith.mulf %57, %56 : vector<8x16xf32>
      %cst_35 = arith.constant 5.000000e-01 : f32
      %59 = vector.broadcast %cst_35 : f32 to vector<8x16xf32>
      %60 = arith.mulf %59, %55 : vector<8x16xf32>
      %61 = arith.addf %58, %60 : vector<8x16xf32>
      %62 = arith.truncf %61 : vector<8x16xf32> to vector<8x16xbf16>
      %c0_36 = arith.constant 0 : index
      %c0_37 = arith.constant 0 : index
      %63 = vector.load %arg11[%c0_36, %c0_37] : memref<16x16xbf16, #tpu.memory_space<vmem>>, vector<16x16xbf16>
      %cst_38 = arith.constant dense<0.000000e+00> : vector<8x16xf32>
      %64 = tpu.matmul %62, %63, %cst_38 {dimension_numbers = #tpu.dot_dimension_numbers<[1], [0], [0], [1], [0, 0, 1, 1], [], []>} : vector<8x16xbf16>, vector<16x16xbf16>, vector<8x16xf32> -> vector<8x16xf32>
      %c0_39 = arith.constant 0 : index
      %c0_40 = arith.constant 0 : index
      %65 = vector.load %arg12[%c0_39, %c0_40] : memref<1x16xf32, #tpu.memory_space<vmem>>, vector<1x16xf32>
      %66 = vector.broadcast %65 : vector<1x16xf32> to vector<8x16xf32>
      %67 = arith.addf %64, %66 : vector<8x16xf32>
      %cst_41 = arith.constant 0.000000e+00 : f32
      %68 = vector.broadcast %cst_41 : f32 to vector<8x16xf32>
      %69 = arith.maximumf %67, %68 : vector<8x16xf32>
      %70 = arith.truncf %69 : vector<8x16xf32> to vector<8x16xbf16>
      %c0_42 = arith.constant 0 : index
      %c0_43 = arith.constant 0 : index
      %71 = vector.load %arg13[%c0_42, %c0_43] : memref<16x16xbf16, #tpu.memory_space<vmem>>, vector<16x16xbf16>
      %cst_44 = arith.constant dense<0.000000e+00> : vector<8x16xf32>
      %72 = tpu.matmul %70, %71, %cst_44 {dimension_numbers = #tpu.dot_dimension_numbers<[1], [0], [0], [1], [0, 0, 1, 1], [], []>} : vector<8x16xbf16>, vector<16x16xbf16>, vector<8x16xf32> -> vector<8x16xf32>
      %c0_45 = arith.constant 0 : index
      %c0_46 = arith.constant 0 : index
      %73 = vector.load %arg14[%c0_45, %c0_46] : memref<1x16xf32, #tpu.memory_space<vmem>>, vector<1x16xf32>
      %74 = vector.broadcast %73 : vector<1x16xf32> to vector<8x16xf32>
      %75 = arith.addf %72, %74 : vector<8x16xf32>
      %76 = vector.broadcast %25 : vector<8x1xf32> to vector<8x16xf32>
      %77 = arith.mulf %75, %76 : vector<8x16xf32>
      %78 = arith.addf %77, %61 : vector<8x16xf32>
      %c0_47 = arith.constant 0 : index
      %c0_48 = arith.constant 0 : index
      %79 = vector.load %arg16[%c0_47, %c0_48] : memref<8x16xf32, #tpu.memory_space<vmem>>, vector<8x16xf32>
      tpu.vector_store %arg16[%c0_47, %c0_48], %78 {strides = array<i32>} : memref<8x16xf32, #tpu.memory_space<vmem>>, vector<8x16xf32>,
    } else {
    }
    return
  }
  func.func @transform_0(%arg0: i32, %arg1: i32) -> i32 {
    %c0_i32 = arith.constant 0 : i32
    %c0_i32_0 = arith.constant 0 : i32
    return %c0_i32 : i32
  }
  func.func @transform_1(%arg0: i32, %arg1: i32) -> i32 {
    %c0_i32 = arith.constant 0 : i32
    %c0_i32_0 = arith.constant 0 : i32
    return %c0_i32 : i32
  }
  func.func @transform_2(%arg0: i32, %arg1: i32) -> (i32, i32) {
    %c0_i32 = arith.constant 0 : i32
    return %arg0, %arg1 : i32, i32
  }
  func.func @transform_3(%arg0: i32, %arg1: i32) -> (i32, i32) {
    %c0_i32 = arith.constant 0 : i32
    %c0_i32_0 = arith.constant 0 : i32
    return %arg1, %c0_i32 : i32, i32
  }
  func.func @transform_4(%arg0: i32, %arg1: i32) -> (i32, i32) {
    %c0_i32 = arith.constant 0 : i32
    %c0_i32_0 = arith.constant 0 : i32
    %c0_i32_1 = arith.constant 0 : i32
    return %c0_i32, %c0_i32_0 : i32, i32
  }
  func.func @transform_5(%arg0: i32, %arg1: i32) -> (i32, i32) {
    %c0_i32 = arith.constant 0 : i32
    %c0_i32_0 = arith.constant 0 : i32
    return %arg0, %c0_i32 : i32, i32
  }
  func.func @transform_6(%arg0: i32, %arg1: i32) -> (i32, i32) {
    %c0_i32 = arith.constant 0 : i32
    %c0_i32_0 = arith.constant 0 : i32
    return %arg0, %c0_i32 : i32, i32
  }
  func.func @transform_7(%arg0: i32, %arg1: i32) -> (i32, i32) {
    %c0_i32 = arith.constant 0 : i32
    %c0_i32_0 = arith.constant 0 : i32
    %c0_i32_1 = arith.constant 0 : i32
    return %c0_i32, %c0_i32_0 : i32, i32
  }
  func.func @transform_8(%arg0: i32, %arg1: i32) -> (i32, i32) {
    %c0_i32 = arith.constant 0 : i32
    %c0_i32_0 = arith.constant 0 : i32
    %c0_i32_1 = arith.constant 0 : i32
    return %c0_i32, %c0_i32_0 : i32, i32
  }
  func.func @transform_9(%arg0: i32, %arg1: i32) -> (i32, i32) {
    %c0_i32 = arith.constant 0 : i32
    %c0_i32_0 = arith.constant 0 : i32
    %c0_i32_1 = arith.constant 0 : i32
    return %c0_i32, %c0_i32_0 : i32, i32
  }
  func.func @transform_10(%arg0: i32, %arg1: i32) -> (i32, i32) {
    %c0_i32 = arith.constant 0 : i32
    %c0_i32_0 = arith.constant 0 : i32
    %c0_i32_1 = arith.constant 0 : i32
    return %c0_i32, %c0_i32_0 : i32, i32
  }
  func.func @transform_11(%arg0: i32, %arg1: i32) -> (i32, i32) {
    %c0_i32 = arith.constant 0 : i32
    %c0_i32_0 = arith.constant 0 : i32
    %c0_i32_1 = arith.constant 0 : i32
    return %c0_i32, %c0_i32_0 : i32, i32
  }
  func.func @transform_12(%arg0: i32, %arg1: i32) -> (i32, i32) {
    %c0_i32 = arith.constant 0 : i32
    %c0_i32_0 = arith.constant 0 : i32
    %c0_i32_1 = arith.constant 0 : i32
    return %c0_i32, %c0_i32_0 : i32, i32
  }
  func.func @transform_13(%arg0: i32, %arg1: i32) -> (i32, i32) {
    %c0_i32 = arith.constant 0 : i32
    %c0_i32_0 = arith.constant 0 : i32
    return %arg0, %c0_i32 : i32, i32
  }
  func.func @transform_14(%arg0: i32, %arg1: i32) -> (i32, i32) {
    %c0_i32 = arith.constant 0 : i32
    %c0_i32_0 = arith.constant 0 : i32
    return %arg0, %c0_i32 : i32, i32
  }
}

</mosaic_0001>

<bundles_post_ra>
// kernel: tpu_custom_call.1
= control target key start
LH: loop header
LB: loop body
LE: loop exit
PB: predicated region body
PF: predicated region fallthrough
CT: control target
= control target key end

     0   :  { %21 = vsyncpa [#allocation6], 0  ;;  %s832_s0 = inlined_call_operand.vmem [shape: f32[2], index: 0, kind: input, shape index: {}]   ;;  %s833_s1 = inlined_call_operand.<no memory space> [shape: s32[1], index: 1, kind: input, shape index: {}]   ;;  %s834_s2 = inlined_call_operand.vmem [shape: bf16[8,8], index: 2, kind: input, shape index: {}]   ;;  %s835_s3 = inlined_call_operand.vmem [shape: bf16[8,16], index: 3, kind: input, shape index: {}]   ;;  %s836_s4 = inlined_call_operand.vmem [shape: bf16[16,1], index: 4, kind: input, shape index: {}]   ;;  %s837_s5 = inlined_call_operand.vmem [shape: f32[8,16], index: 5, kind: input, shape index: {}]   ;;  %s838_s6 = inlined_call_operand.vmem [shape: bf16[8,128], index: 6, kind: input, shape index: {}]   ;;  %s839_s7 = inlined_call_operand.vmem [shape: f32[1,128], index: 7, kind: input, shape index: {}]   ;;  %s840_s8 = inlined_call_operand.vmem [shape: bf16[128,16], index: 8, kind: input, shape index: {}]   ;;  %s841_s9 = inlined_call_operand.vmem [shape: bf16[16,16], index: 9, kind: input, shape index: {}]   ;;  %s842_s10 = inlined_call_operand.vmem [shape: f32[1,16], index: 10, kind: input, shape index: {}]   ;;  %s843_s11 = inlined_call_operand.vmem [shape: bf16[16,16], index: 11, kind: input, shape index: {}]   ;;  %s844_s12 = inlined_call_operand.vmem [shape: f32[1,16], index: 12, kind: input, shape index: {}]   ;;  %s845_s13 = inlined_call_operand.vmem [shape: f32[8,1], index: 13, kind: output, shape index: {0}]   ;;  %s846_s14 = inlined_call_operand.hbm [shape: f32[8,16], index: 14, kind: output, shape index: {1}]  }
   0x1   :  { %22 = vsyncpa [#allocation5], 0  ;;  %s29_s15 = sshll.u32 %s832_s0, 4  ;;  %s30_s15 = int_to_ptr.vmem [resolvable:$true] %s29_s15 }
   0x2   :  { %s597_s16 = scalar_lea.vmem %s30_s15, 16  ;;  %p602_p1 = scmp.lt.s32.totalorder %s30_s15, %s30_s15 }
   0x3   :  { %p598_p0 = scmp.ne.s32.totalorder %s30_s15, %s597_s16  ;;  %p603_p2 = scmp.lt.s32.totalorder %s597_s16, %s597_s16 }
   0x5   :  { %p604_p3 = por %p603_p2, %p602_p1 }
   0x7   :  { %p605_p4 = pnand %p604_p3, %p598_p0 }
   0x9   :  { %608 = shalt.err (!%p605_p4)
}
   0xa   :  { %s635_s17 = smov [#allocation4]  }
   0xb   :  { %32 = dma.vmem_to_smem %s30_s15, 16, %s635_s17, [#allocation6]  }
   0xc   :  { %631 = dma.done.wait [#allocation6], 16  }
   0xd   :  { %632 = vsyncadd [#allocation6], 4294967280 }
   0xe   :  { %60 = sfence }
   0xf   :  { %v722_v0 = vld [vmem:[%s839_s7] sm:$0x1]  ;;  %s636_s20 = smov 127   ;;  %v637_v1 = vmov 0   ;;  %s494_s0 = sld [smem:[#allocation4 + $0x1]]  ;;  %v194_v2 = vlaneseq  ;;  %vm204_vm2 = vcmask 1040384  }
  0x10   :  { %192 = vrot.lane.b32.xlu0 %v722_v0, %s636_s20  ;;  %580 = vset.pattern.permute.xlu1 %v637_v1  ;;  %s496_s23 = sadd.s32 4294967295, %s833_s1  ;;  %v582_v14 = vld [vmem:[%s840_s8] sm:$0xff]   ;;  %v638_v15 = vmov 0.0   ;;  %v583_v17 = vld [vmem:[%s840_s8 + $0x8] sm:$0xff]   ;;  %vm639_vm4 = vmmov 0   ;;  %vm77_vm5 = vcmask 130048  }
  0x11   :  { %581 = vset.pattern.permute.xlu0 %v637_v1  ;;  %v729_v3 = vand.u32 127, %v194_v2  ;;  %v197_v4 = vstv %s496_s23  ;;  %540 = vmatprep.subr.bf16.mxu0 %v638_v15  ;;  %v585_v16 = vld [vmem:[%s836_s4] sm:$0xff]   ;;  %v584_v19 = vld [vmem:[%s840_s8 + $0x10] sm:$0xff]   ;;  %v586_v20 = vld [vmem:[%s840_s8 + $0x18] sm:$0xff]   ;;  %v232_v37 = vshrl.u32 %v194_v2, 7  ;;  %vm128_vm7 = vcmask 1043456  }
  0x12   :  { %528 = vmatprep.subr.bf16.mxu1 %v638_v15  ;;  %541 = vmatpush3.bf16.msra.mxu0 %v582_v14  ;;  %v68_v18 = vld [vmem:[%s835_s3] sm:$0xf]  ;;  %v588_v22 = vld [vmem:[%s840_s8 + $0x28] sm:$0xff]   ;;  %v589_v23 = vld [vmem:[%s840_s8 + $0x30] sm:$0xff]   ;;  %vm124_vm8 = vcmask 64512   ;;  %vm66_vm9 = vcmask 7168  }
  0x13   :  { %vm198_vm0 = vcmp.lt.s32.totalorder %v729_v3, %v197_v4  ;;  %530 = vmatprep.mubr.msk.bf16.mxu1 %vm639_vm4, %v638_v15  ;;  %542 = vmatprep.subr.bf16.mxu0 %v638_v15  ;;  %v587_v21 = vld [vmem:[%s840_s8 + $0x20] sm:$0xff]   ;;  %v590_v24 = vld [vmem:[%s840_s8 + $0x38] sm:$0xff]   ;;  %v233_v39 = vsub.s32 0, %v232_v37  ;;  %67 = vst.msk [vmem:[#allocation2] sm:$0xff] %vm66_vm9, %v638_v15 }
  0x14   :  { %529 = vmatpush3.bf16.msra.mxu1 %v585_v16  ;;  %556 = vmatprep.mubr.msk.bf16.mxu0 %vm639_vm4, %v638_v15  ;;  %v229_v38 = vld [vmem:[%s838_s6] sm:$0xf] }
  0x15   :  { %v200_v6 = vstv %s494_s0  ;;  %534 = vmatprep.subr.bf16.mxu1 %v638_v15  ;;  %v230_v41 = vunpack.c.l.bf16 %v229_v38  ;;  %v122_v52 = vld [vmem:[%s834_s2] sm:$0xf] }
  0x16   :  { %543 = vmatpush3.bf16.msra.mxu0 %v583_v17  ;;  %v591_v53 = vld [vmem:[%s841_s9] sm:$0xff]  }
  0x17   :  { %531 = vmatmul.mubr.msk.bf16.vlgmr.msra.gmra.mrb[0].mxu1 %vm77_vm5, %v68_v18  ;;  %544 = vmatprep.subr.bf16.mxu0 %v638_v15  ;;  %v341_v54 = vld [vmem:[%s837_s5] sm:$0xff]  ;;  %s178_s5 = sld [smem:[#allocation4]] }
  0x18   :  { %536 = vmatprep.mubr.msk.bf16.mxu1 %vm639_vm4, %v638_v15  ;;  %v342_v55 = vmul.f32 0.5, %v341_v54  ;;  %v592_v62 = vld [vmem:[%s843_s11] sm:$0xff]  }
  0x1a   :  { %545 = vmatpush3.bf16.msra.mxu0 %v584_v19 }
  0x1b   :  { %546 = vmatprep.subr.bf16.mxu0 %v638_v15 }
  0x1e   :  { %547 = vmatpush3.bf16.msra.mxu0 %v586_v20 }
  0x1f   :  { %548 = vmatprep.subr.bf16.mxu0 %v638_v15 }
  0x22   :  { %549 = vmatpush3.bf16.msra.mxu0 %v587_v21  ;;  %v508_v21 = vld [vmem:[%s844_s12] ss:$0 sm:$0xff] }
  0x23   :  { %550 = vmatprep.subr.bf16.mxu0 %v638_v15 }
  0x26   :  { %551 = vmatpush3.bf16.msra.mxu0 %v588_v22 }
  0x27   :  { %552 = vmatprep.subr.bf16.mxu0 %v638_v15 }
  0x2a   :  { %553 = vmatpush3.bf16.msra.mxu0 %v589_v23 }
  0x2b   :  { %554 = vmatprep.subr.bf16.mxu0 %v638_v15 }
  0x2e   :  { %555 = vmatpush3.bf16.msra.mxu0 %v590_v24 }
  0x82   :  { %v193_v5 = vpop.permute.xlu0 %192 }
  0x83   :  { %v199_v7 = vsub.f32 %v193_v5, %v722_v0 }
  0x85   :  { %vm201_vm1 = vcmp.gt.f32.partialorder %v199_v7, %v200_v6  ;;  %v182_v6 = vstv %s178_s5 }
  0x86   :  { %vm202_vm3 = vmand %vm198_vm0, %vm201_vm1 }
  0x87   :  { %v203_v8 = vsel %vm202_vm3, 1, %v637_v1 }
  0x88   :  { %v205_v9 = vsel %vm204_vm2, %v203_v8, 0 }
  0x89   :  { %v207_v10 = vshrl.u32 %v205_v9, 16  ;;  %v206_v11 = vand.u32 65535, %v205_v9 }
  0x8b   :  { %v209_v12 = vcvt.s32.f32 %v207_v10  ;;  %v208_v13 = vcvt.s32.f32 %v206_v11 }
  0x8d   :  { %212 = vadd.xlane.f32.xlu0 %v209_v12  ;;  %210 = vadd.xlane.f32.xlu1 %v208_v13  ;;  %v505_v13 = vld [vmem:[%s842_s10] ss:$0 sm:$0xff] }
  0xea   :  { %v115_v46 = vpop.f32.mrb[0].mxu1 }
  0xeb   :  { %v123_v47 = vpack.c.bf16 %v115_v46, %v115_v46  ;;  %v532_v48 = vpop.f32.mrb[1].mxu1 }
  0xec   :  { %v118_v49 = vpop.f32.mrb[2].mxu1 }
  0xed   :  { %v130_v50 = vsel %vm128_vm7, %v123_v47, 0  ;;  %v533_v51 = vpop.f32.mrb[3].mxu1 }
  0xee   :  { %535 = vmatpush3.bf16.msra.mxu1 %v130_v50 }
  0xef   :  { %560 = vmatprep.subr.bf16.mxu1 %v638_v15 }
  0xf1   :  { %537 = vmatmul.mubr.msk.bf16.vlgmr.msra.gmra.mrb[4].mxu1 %vm124_vm8, %v122_v52 }
  0xf2   :  { %561 = vmatpush3.bf16.msra.mxu1 %v591_v53  ;;  %562 = vmatprep.mubr.msk.bf16.mxu1 %vm639_vm4, %v638_v15 }
  0xf3   :  { %566 = vmatprep.subr.bf16.mxu1 %v638_v15 }
 0x11a   :  { %v213_v25 = vpop.xlane.xlu0 %212  ;;  %v211_v26 = vpop.xlane.xlu1 %210 }
 0x11b   :  { %v215_v27 = vcvt.f32.s32 %v213_v25  ;;  %v214_v29 = vcvt.f32.s32 %v211_v26 }
 0x11d   :  { %v216_v28 = vshll.u32 %v215_v27, 16 }
 0x11f   :  { %v217_v30 = vadd.s32 %v216_v28, %v214_v29 }
 0x121   :  { %v218_v31 = vrot.slane %v217_v30, 4 }
 0x123   :  { %v219_v32 = vadd.s32 %v218_v31, %v217_v30 }
 0x125   :  { %v220_v33 = vrot.slane %v219_v32, 2 }
 0x127   :  { %v221_v34 = vadd.s32 %v220_v33, %v219_v32 }
 0x129   :  { %v222_v35 = vrot.slane %v221_v34, 1 }
 0x12b   :  { %v223_v36 = vadd.s32 %v222_v35, %v221_v34 }
 0x12d   :  { %572 = vpush %v223_v36 }
 0x15e   :  { %s573_s23 = spop %572 }
 0x15f   :  { %s225_s8 = sadd.s32 1, %s573_s23 }
 0x160   :  { %v226_v40 = vstv %s225_s8 }
 0x161   :  { %vm227_vm6 = vcmp.lt.s32.totalorder %v729_v3, %v226_v40 }
 0x162   :  { %v228_v42 = vsel %vm227_vm6, %v722_v0, 0.0  ;;  %v121_v0 = vld [vmem:[#allocation2] sm:$0xff] }
 0x163   :  { %v234_v43 = vrot.slane %v228_v42, %v233_v39 }
 0x165   :  { %v235_v44 = vmul.f32 %v234_v43, %v230_v41 }
 0x167   :  { %v236_v45 = vpack.c.bf16 %v235_v44, %v235_v44 }
 0x169   :  { %557 = vmatmul.mubr.bf16.vlgmr.msra.gmra.mrb[0].mxu0 %v236_v45 }
 0x1c4   :  { %v166_v1 = vpop.f32.mrb[4].mxu1 }
 0x1c5   :  { %v172_v2 = vadd.f32 %v166_v1, %v121_v0  ;;  %v538_v3 = vpop.f32.mrb[5].mxu1 }
 0x1c6   :  { %v169_v4 = vpop.f32.mrb[6].mxu1 }
 0x1c7   :  { %174 = vst.msk [vmem:[#allocation2] sm:$0xff] %vm66_vm9, %v172_v2  ;;  %v539_v5 = vpop.f32.mrb[7].mxu1 }
 0x1ce   :  { %v181_v7 = vld [vmem:[#allocation2] sm:$0xff] }
 0x1cf   :  { %v183_v8 = vadd.f32 %v182_v6, %v181_v7 }
 0x1d1   :  { %v495_v9 = vmul.f32 -1.442695, %v183_v8 }
 0x1d3   :  { %593 = vpow2.f32 %v495_v9 }
 0x1dd   :  { %v594_v10 = vpop.eup %593 }
 0x1de   :  { %v187_v11 = vadd.f32 1.0, %v594_v10 }
 0x1e0   :  { %595 = vrcp.f32 %v187_v11 }
 0x1ea   :  { %v596_v12 = vpop.eup %595 }
 0x1eb   :  { %190 = vst.msk [vmem:[%s845_s13] sm:$0xff] %vm66_vm9, %v596_v12  ;;  %466 = vperm.xlu1 %580, %v596_v12   ;;  %s640_s13 = smov [#allocation7]  }
 0x1ec   :  { %s480_s10 = sshll.u32 %s640_s13, 4  ;;  %s481_s10 = int_to_ptr.vmem [resolvable:$true] %s480_s10 }
 0x1ed   :  { %s609_s16 = scalar_lea.vmem %s481_s10, 128  ;;  %p614_p6 = scmp.lt.s32.totalorder %s481_s10, %s481_s10 }
 0x1ee   :  { %p610_p5 = scmp.ne.s32.totalorder %s481_s10, %s609_s16  ;;  %p615_p7 = scmp.lt.s32.totalorder %s609_s16, %s609_s16 }
 0x1f0   :  { %p616_p8 = por %p615_p7, %p614_p6 }
 0x1f2   :  { %p617_p9 = pnand %p616_p8, %p610_p5 }
 0x23c   :  { %v335_v56 = vpop.f32.mrb[0].mxu0 }
 0x23d   :  { %v343_v57 = vmul.f32 0.5, %v335_v56  ;;  %v558_v58 = vpop.f32.mrb[1].mxu0 }
 0x23e   :  { %v338_v59 = vpop.f32.mrb[2].mxu0 }
 0x23f   :  { %v344_v60 = vadd.f32 %v343_v57, %v342_v55  ;;  %v559_v61 = vpop.f32.mrb[3].mxu0 }
 0x241   :  { %v345_v63 = vpack.c.bf16 %v344_v60, %v344_v60 }
 0x243   :  { %563 = vmatmul.mubr.msk.bf16.vlgmr.msra.gmra.mrb[8].mxu1 %vm77_vm5, %v345_v63 }
 0x244   :  { %567 = vmatpush3.bf16.msra.mxu1 %v592_v62  ;;  %568 = vmatprep.mubr.msk.bf16.mxu1 %vm639_vm4, %v638_v15 }
 0x26a   :  { %v467_v25 = vpop.permute.xlu1 %466 }
 0x316   :  { %v398_v14 = vpop.f32.mrb[8].mxu1 }
 0x317   :  { %v399_v15 = vadd.f32 %v505_v13, %v398_v14  ;;  %v564_v16 = vpop.f32.mrb[9].mxu1 }
 0x318   :  { %v401_v17 = vpop.f32.mrb[10].mxu1 }
 0x319   :  { %v404_v18 = vmax.f32 %v399_v15, 0.0  ;;  %v565_v19 = vpop.f32.mrb[11].mxu1 }
 0x31b   :  { %v405_v20 = vpack.c.bf16 %v404_v18, %v404_v18 }
 0x31d   :  { %569 = vmatmul.mubr.msk.bf16.vlgmr.msra.gmra.mrb[12].mxu1 %vm77_vm5, %v405_v20 }
 0x3f0   :  { %v458_v22 = vpop.f32.mrb[12].mxu1 }
 0x3f1   :  { %v459_v23 = vadd.f32 %v508_v21, %v458_v22  ;;  %v570_v24 = vpop.f32.mrb[13].mxu1 }
 0x3f2   :  { %v461_v26 = vpop.f32.mrb[14].mxu1 }
 0x3f3   :  { %v469_v27 = vmul.f32 %v467_v25, %v459_v23  ;;  %v571_v28 = vpop.f32.mrb[15].mxu1 }
 0x3f5   :  { %v470_v29 = vadd.f32 %v469_v27, %v344_v60 }
 0x3f7   :  { %471 = vst.msk [vmem:[#allocation7] sm:$0xff] %vm77_vm5, %v470_v29 }
 0x3f8   :  { %620 = shalt.err (!%p617_p9)
}
 0x3f9   :  { %s621_s18 = scalar_lea.hbm %s846_s14, 128 }
 0x3fa   :  { %p622_p10 = scmp.ne.s32.totalorder %s846_s14, %s621_s18  ;;  %p625_p11 = scmp.lt.u32.totalorder %s621_s18, %s846_s14 }
 0x3fc   :  { %p627_p12 = pnand %p625_p11, %p622_p10 }
 0x3fe   :  { %630 = shalt.err (!%p627_p12)
}
 0x3ff   :  { %483 = dma.vmem_to_hbm [thread:$0]  %s481_s10, 128, %s846_s14, [#allocation5]  }
 0x400   :  { %633 = dma.done.wait [#allocation5], 128  }
 0x401   :  { %634 = vsyncadd [#allocation5], 4294967168 }
 0x402   :  { %489 = vsyncpa [#allocation5], 1 }
 0x403   :  { %490 = vsyncpa [#allocation6], 1 }

</bundles_post_ra>
